<compile_context>
chip_gen: v5e
topology: v5e:2x2
jax: 0.10.0
libtpu: 0.0.40
codegen_flags: <defaults>
</compile_context>

<pallas_src>
import numpy as np

import jax
import jax.numpy as jnp
from jax import lax
from jax.experimental import pallas as pl
from jax.experimental.pallas import tpu as pltpu

LANE = 128  # lane width: pad conv channels and classes to one full lane group


def make_cnn_kernel(tile_b, L, E, K_max, n_pad):
    rows = tile_b * L

    def kernel(x_ref, w_ref, fcw_ref, convb_ref, fcb_ref, mask_ref, out_ref):
        x = x_ref[...]                                        # (rows, E) f32

        # ---- im2col: column block k holds rows shifted by k (XLU sublane
        # rolls, no unaligned sublane slices).  Wrapped rows are only ever
        # read at window positions killed by the mask, or multiplied by the
        # zero-padded taps of shorter filters. ---------------------------
        cols = [x]
        for k in range(1, K_max):
            cols.append(pltpu.roll(x, shift=rows - k, axis=0))   # == roll(x, -k)
        xcol = jnp.concatenate(cols, axis=1).astype(jnp.bfloat16)  # (rows, K_max*E)

        # ---- all convolutions in ONE MXU matmul (f32 accumulation),
        # lane-dense output (n_pad = 128 channels) ------------------------
        acc = lax.dot_general(
            xcol, w_ref[...],
            dimension_numbers=(((1,), (0,)), ((), ())),
            preferred_element_type=jnp.float32)               # (rows, n_pad)

        # bias + ReLU (f32), then zero out invalid window positions with the
        # precomputed {0,1} mask (0 is neutral: ReLU output >= 0).
        act = jnp.maximum(acc + convb_ref[...], 0.0) * mask_ref[...]

        # ---- max-over-time per sequence (L % 8 == 0 -> aligned reshape) --
        pooled = jnp.max(act.reshape(tile_b, L, n_pad), axis=1)  # (tile_b, n_pad)

        # ---- final Linear in f32 (dropout p=0.1 is identity in eval) -----
        out = lax.dot_general(
            pooled, fcw_ref[...],
            dimension_numbers=(((1,), (0,)), ((), ())),
            preferred_element_type=jnp.float32) + fcb_ref[...]
        out_ref[...] = out                                     # (tile_b, c_pad)

    return kernel


def _time_valid_mask(tile_b, L, num_filters, filter_sizes, n_pad):
    """Static {0,1} f32 mask: 1 where window position t is valid for channel c."""
    rows = tile_b * L
    t = np.arange(rows) % L
    mask = np.zeros((rows, n_pad), np.float32)
    off = 0
    for n, K in zip(num_filters, filter_sizes):
        valid_t = (t < (L - K + 1)).astype(np.float32)[:, None]   # (rows, 1)
        mask[:, off:off + n] = valid_t
        off += n
    return jnp.asarray(mask)


def cnn_forward(tokens, params, *, num_filters, filter_sizes, tile_b=None):
    emb_table = params["embedding"]
    B, L = tokens.shape
    E = emb_table.shape[1]
    K_max = max(filter_sizes)
    n_total = sum(num_filters)
    n_classes = params["fc_b"].shape[-1]

    assert L >= K_max, "sequence length shorter than the largest filter size"
    assert L % 8 == 0, "L must be a multiple of 8 (sublane-aligned reshape)"
    n_pad = LANE
    c_pad = LANE
    assert n_total <= n_pad and n_classes <= c_pad

    # Whole sequences per grid step; multiple-of-8 output rows when possible.
    # At real sizes raise tile_b until tile_b*L is a few thousand rows on
    # v5e/v6e and roughly half that on v7x (64 MiB VMEM, K_max x im2col blowup).
    if tile_b is None:
        tile_b = 8 if (B % 8 == 0) else B
    assert B % tile_b == 0
    grid = (B // tile_b,)
    rows = tile_b * L

    # glue: embedding lookup (gather) + flatten, in plain JAX/XLA.
    # TODO(synk): fuse via scalar-prefetched tokens + per-row DMA gather.
    emb = jnp.take(emb_table, tokens.astype(jnp.int32), axis=0)      # (B, L, E)
    x_flat = emb.reshape(B * L, E).astype(jnp.float32)               # (B*L, E)

    # Fuse conv weights: zero-pad taps to K_max, flatten (K, E), concat over
    # the filter axis, zero-pad channels to n_pad -> (K_max*E, n_pad) bf16.
    w_blocks = []
    for n, K in zip(num_filters, filter_sizes):
        w = params[f"conv{K}_w"]                                     # (n, K, E)
        w = jnp.pad(w, ((0, 0), (0, K_max - K), (0, 0)))             # (n, K_max, E)
        w_blocks.append(w.reshape(n, K_max * E))
    w_all = jnp.concatenate(w_blocks, axis=0)                        # (n_total, K_max*E)
    w_all = jnp.pad(w_all, ((0, n_pad - n_total), (0, 0)))           # (n_pad, K_max*E)
    w_all = w_all.T.astype(jnp.bfloat16)                             # (K_max*E, n_pad)

    conv_b = jnp.concatenate(
        [params[f"conv{K}_b"] for K in filter_sizes], axis=1)        # (1, n_total)
    conv_b = jnp.pad(conv_b, ((0, 0), (0, n_pad - n_total))).astype(jnp.float32)

    fc_w = jnp.pad(params["fc_w"].T,
                   ((0, n_pad - n_total), (0, c_pad - n_classes))
                   ).astype(jnp.float32)                             # (n_pad, c_pad)
    fc_b = jnp.pad(params["fc_b"],
                   ((0, 0), (0, c_pad - n_classes))).astype(jnp.float32)  # (1, c_pad)

    mask = _time_valid_mask(tile_b, L, num_filters, filter_sizes, n_pad)

    kernel = make_cnn_kernel(tile_b, L, E, K_max, n_pad)

    out = pl.pallas_call(
        kernel,
        out_shape=jax.ShapeDtypeStruct((B, c_pad), jnp.float32),
        grid_spec=pltpu.PrefetchScalarGridSpec(
            num_scalar_prefetch=0,
            grid=grid,
            in_specs=[
                pl.BlockSpec((rows, E), lambda i: (i, 0)),            # x tile
                pl.BlockSpec((K_max * E, n_pad), lambda i: (0, 0)),   # conv weights
                pl.BlockSpec((n_pad, c_pad), lambda i: (0, 0)),       # fc weights
                pl.BlockSpec((1, n_pad), lambda i: (0, 0)),           # conv bias
                pl.BlockSpec((1, c_pad), lambda i: (0, 0)),           # fc bias
                pl.BlockSpec((rows, n_pad), lambda i: (0, 0)),        # static mask
            ],
            out_specs=pl.BlockSpec((tile_b, c_pad), lambda i: (i, 0)),
        ),
        compiler_params=pltpu.CompilerParams(
            dimension_semantics=("parallel",),        # shards steps on v7x 2-TC
            vmem_limit_bytes=32 * 1024 * 1024,        # fits v7x scoped VMEM
        ),
    )(x_flat, w_all, fc_w, conv_b, fc_b, mask)

    return out[:, :n_classes]


def cnn_reference(tokens, params, *, num_filters, filter_sizes):
    """Pure-JAX f32 reference mirroring the PyTorch forward (eval mode)."""
    emb = jnp.take(params["embedding"], tokens.astype(jnp.int32), axis=0)
    B, L, E = emb.shape
    feats = []
    for n, K in zip(num_filters, filter_sizes):
        w = params[f"conv{K}_w"]                  # (n, K, E)
        b = params[f"conv{K}_b"]                  # (1, n)
        T = L - K + 1
        windows = jnp.stack([emb[:, k:k + T, :] for k in range(K)], axis=2)
        conv = jnp.einsum("btke,nke->btn", windows, w) + b
        conv = jnp.maximum(conv, 0.0)
        feats.append(jnp.max(conv, axis=1))       # (B, n)
    feat = jnp.concatenate(feats, axis=1)
    return feat @ params["fc_w"].T + params["fc_b"]


if __name__ == "__main__":
    # Module hyperparameters (small, consistent with the forward pass).
    max_features = 100
    embed_size = 32
    num_filters = [8, 8, 8]          # all equal so fc1 in-dim matches the concat
    filter_sizes = [3, 4, 5]
    B, L = 16, 16                    # B=16 -> a 2-step batch grid (tile_b=8)

    key = jax.random.PRNGKey(0)
    k_tok, k_emb, k_fc, *k_convs = jax.random.split(key, 3 + len(filter_sizes))

    tokens = jax.random.randint(k_tok, (B, L), 0, max_features, dtype=jnp.int32)

    params = {
        "embedding": 0.1 * jax.random.normal(
            k_emb, (max_features, embed_size), jnp.float32),
        "fc_w": 0.1 * jax.random.normal(
            k_fc, (5, num_filters[-1] * len(filter_sizes)), jnp.float32),
        "fc_b": jnp.linspace(-0.1, 0.1, 5, dtype=jnp.float32).reshape(1, 5),
    }
    for kc, (n, K) in zip(k_convs, zip(num_filters, filter_sizes)):
        params[f"conv{K}_w"] = 0.1 * jax.random.normal(
            kc, (n, K, embed_size), jnp.float32)
        params[f"conv{K}_b"] = jnp.linspace(
            -0.05, 0.05, n, dtype=jnp.float32).reshape(1, n)

    out = cnn_forward(tokens, params,
                      num_filters=num_filters, filter_sizes=filter_sizes)
    out = jax.block_until_ready(out)

    ref = cnn_reference(tokens, params,
                        num_filters=num_filters, filter_sizes=filter_sizes)
    assert out.shape == (B, 5), out.shape
    # Conv matmul uses bf16 inputs (f32 accumulation); fc matmul is f32.
    assert jnp.allclose(out, ref, atol=2e-2, rtol=2e-2), (out, ref)
    print("KERNEL_OK")
</pallas_src>

<mosaic_0001>
module attributes {stable_mosaic.version = 11 : i64} {
  func.func @kernel(%arg0: i32, %arg1: memref<128x32xf32, #tpu.memory_space<vmem>>, %arg2: memref<160x128xbf16, #tpu.memory_space<vmem>>, %arg3: memref<128x128xf32, #tpu.memory_space<vmem>>, %arg4: memref<1x128xf32, #tpu.memory_space<vmem>>, %arg5: memref<1x128xf32, #tpu.memory_space<vmem>>, %arg6: memref<128x128xf32, #tpu.memory_space<vmem>>, %arg7: memref<8x128xf32, #tpu.memory_space<vmem>>) attributes {dimension_semantics = [#tpu.dimension_semantics<parallel>], iteration_bounds = array<i64: 2>, scalar_prefetch = 0 : i64, scratch_operands = 0 : i64, tpu.core_type = #tpu.core_type<tc>, window_params = [{transform_indices = @transform_0, window_bounds = array<i64: 128, 32>}, {pipeline_mode = #tpu.pipeline_mode<synchronous>, transform_indices = @transform_1, window_bounds = array<i64: 160, 128>}, {pipeline_mode = #tpu.pipeline_mode<synchronous>, transform_indices = @transform_2, window_bounds = array<i64: 128, 128>}, {pipeline_mode = #tpu.pipeline_mode<synchronous>, transform_indices = @transform_3, window_bounds = array<i64: 1, 128>}, {pipeline_mode = #tpu.pipeline_mode<synchronous>, transform_indices = @transform_4, window_bounds = array<i64: 1, 128>}, {pipeline_mode = #tpu.pipeline_mode<synchronous>, transform_indices = @transform_5, window_bounds = array<i64: 128, 128>}, {transform_indices = @transform_6, window_bounds = array<i64: 8, 128>}]} {
    %c0 = arith.constant 0 : index
    %c0_0 = arith.constant 0 : index
    %0 = vector.load %arg1[%c0, %c0_0] : memref<128x32xf32, #tpu.memory_space<vmem>>, vector<128x32xf32>
    %c127_i32 = arith.constant 127 : i32
    %1 = tpu.dynamic_rotate %0 by %c127_i32 dim 0 : vector<128x32xf32>, i32 -> vector<128x32xf32>
    %c126_i32 = arith.constant 126 : i32
    %2 = tpu.dynamic_rotate %0 by %c126_i32 dim 0 : vector<128x32xf32>, i32 -> vector<128x32xf32>
    %c125_i32 = arith.constant 125 : i32
    %3 = tpu.dynamic_rotate %0 by %c125_i32 dim 0 : vector<128x32xf32>, i32 -> vector<128x32xf32>
    %c124_i32 = arith.constant 124 : i32
    %4 = tpu.dynamic_rotate %0 by %c124_i32 dim 0 : vector<128x32xf32>, i32 -> vector<128x32xf32>
    %5 = tpu.concatenate %0, %1, %2, %3, %4 in 1 : vector<128x32xf32>, vector<128x32xf32>, vector<128x32xf32>, vector<128x32xf32>, vector<128x32xf32> -> vector<128x160xf32>
    %6 = arith.truncf %5 : vector<128x160xf32> to vector<128x160xbf16>
    %c0_1 = arith.constant 0 : index
    %c0_2 = arith.constant 0 : index
    %7 = vector.load %arg2[%c0_1, %c0_2] : memref<160x128xbf16, #tpu.memory_space<vmem>>, vector<160x128xbf16>
    %cst = arith.constant dense<0.000000e+00> : vector<128x128xf32>
    %8 = tpu.matmul %6, %7, %cst {dimension_numbers = #tpu.dot_dimension_numbers<[1], [0], [0], [1], [0, 0, 1, 1], [], []>} : vector<128x160xbf16>, vector<160x128xbf16>, vector<128x128xf32> -> vector<128x128xf32>
    %c0_3 = arith.constant 0 : index
    %c0_4 = arith.constant 0 : index
    %9 = vector.load %arg4[%c0_3, %c0_4] : memref<1x128xf32, #tpu.memory_space<vmem>>, vector<1x128xf32>
    %10 = vector.broadcast %9 : vector<1x128xf32> to vector<128x128xf32>
    %11 = arith.addf %8, %10 : vector<128x128xf32>
    %cst_5 = arith.constant 0.000000e+00 : f32
    %12 = vector.broadcast %cst_5 : f32 to vector<128x128xf32>
    %13 = arith.maximumf %11, %12 : vector<128x128xf32>
    %c0_6 = arith.constant 0 : index
    %c0_7 = arith.constant 0 : index
    %14 = vector.load %arg6[%c0_6, %c0_7] : memref<128x128xf32, #tpu.memory_space<vmem>>, vector<128x128xf32>
    %15 = arith.mulf %13, %14 : vector<128x128xf32>
    %16 = vector.shape_cast %15 : vector<128x128xf32> to vector<8x16x128xf32>
    %cst_8 = arith.constant dense<0xFF800000> : vector<8x128xf32>
    %17 = vector.multi_reduction <maximumf>, %16, %cst_8 [1] : vector<8x16x128xf32> to vector<8x128xf32>
    %c0_9 = arith.constant 0 : index
    %c0_10 = arith.constant 0 : index
    %18 = vector.load %arg3[%c0_9, %c0_10] : memref<128x128xf32, #tpu.memory_space<vmem>>, vector<128x128xf32>
    %cst_11 = arith.constant dense<0.000000e+00> : vector<8x128xf32>
    %19 = tpu.matmul %17, %18, %cst_11 {dimension_numbers = #tpu.dot_dimension_numbers<[1], [0], [0], [1], [0, 0, 1, 1], [], []>} : vector<8x128xf32>, vector<128x128xf32>, vector<8x128xf32> -> vector<8x128xf32>
    %c0_12 = arith.constant 0 : index
    %c0_13 = arith.constant 0 : index
    %20 = vector.load %arg5[%c0_12, %c0_13] : memref<1x128xf32, #tpu.memory_space<vmem>>, vector<1x128xf32>
    %21 = vector.broadcast %20 : vector<1x128xf32> to vector<8x128xf32>
    %22 = arith.addf %19, %21 : vector<8x128xf32>
    %c0_14 = arith.constant 0 : index
    %c0_15 = arith.constant 0 : index
    %23 = vector.load %arg7[%c0_14, %c0_15] : memref<8x128xf32, #tpu.memory_space<vmem>>, vector<8x128xf32>
    tpu.vector_store %arg7[%c0_14, %c0_15], %22 {strides = array<i32>} : memref<8x128xf32, #tpu.memory_space<vmem>>, vector<8x128xf32>,
    return
  }
  func.func @transform_0(%arg0: i32) -> (i32, i32) {
    %c0_i32 = arith.constant 0 : i32
    %c0_i32_0 = arith.constant 0 : i32
    return %arg0, %c0_i32 : i32, i32
  }
  func.func @transform_1(%arg0: i32) -> (i32, i32) {
    %c0_i32 = arith.constant 0 : i32
    %c0_i32_0 = arith.constant 0 : i32
    %c0_i32_1 = arith.constant 0 : i32
    return %c0_i32, %c0_i32_0 : i32, i32
  }
  func.func @transform_2(%arg0: i32) -> (i32, i32) {
    %c0_i32 = arith.constant 0 : i32
    %c0_i32_0 = arith.constant 0 : i32
    %c0_i32_1 = arith.constant 0 : i32
    return %c0_i32, %c0_i32_0 : i32, i32
  }
  func.func @transform_3(%arg0: i32) -> (i32, i32) {
    %c0_i32 = arith.constant 0 : i32
    %c0_i32_0 = arith.constant 0 : i32
    %c0_i32_1 = arith.constant 0 : i32
    return %c0_i32, %c0_i32_0 : i32, i32
  }
  func.func @transform_4(%arg0: i32) -> (i32, i32) {
    %c0_i32 = arith.constant 0 : i32
    %c0_i32_0 = arith.constant 0 : i32
    %c0_i32_1 = arith.constant 0 : i32
    return %c0_i32, %c0_i32_0 : i32, i32
  }
  func.func @transform_5(%arg0: i32) -> (i32, i32) {
    %c0_i32 = arith.constant 0 : i32
    %c0_i32_0 = arith.constant 0 : i32
    %c0_i32_1 = arith.constant 0 : i32
    return %c0_i32, %c0_i32_0 : i32, i32
  }
  func.func @transform_6(%arg0: i32) -> (i32, i32) {
    %c0_i32 = arith.constant 0 : i32
    %c0_i32_0 = arith.constant 0 : i32
    return %arg0, %c0_i32 : i32, i32
  }
}

</mosaic_0001>

<bundles_post_ra>
// kernel: tpu_custom_call.1
= control target key start
LH: loop header
LB: loop body
LE: loop exit
PB: predicated region body
PF: predicated region fallthrough
CT: control target
= control target key end

     0   :  { %11 = vsyncpa [#allocation3], 0  ;;  %s2175_s0 = inlined_call_operand.vmem [shape: f32[256,32], index: 0, kind: input, shape index: {}]   ;;  %s2176_s1 = inlined_call_operand.hbm [shape: bf16[160,128], index: 1, kind: input, shape index: {}]   ;;  %s2177_s2 = inlined_call_operand.vmem [shape: f32[128,128], index: 2, kind: input, shape index: {}]   ;;  %s2178_s3 = inlined_call_operand.vmem [shape: f32[1,128], index: 3, kind: input, shape index: {}]   ;;  %s2179_s4 = inlined_call_operand.vmem [shape: f32[1,128], index: 4, kind: input, shape index: {}]   ;;  %s2180_s5 = inlined_call_operand.vmem [shape: f32[128,128], index: 5, kind: input, shape index: {}]   ;;  %s2181_s6 = inlined_call_operand.hbm [shape: f32[16,128], index: 6, kind: output, shape index: {}]  }
   0x1   :  { %12 = vsyncpa [#allocation4], 0 }
   0x2   :  { %14 = vsyncpa [#allocation4 + $0x1], 0  ;;  %s1537_s21 = smov 0   ;;  %s1539_s22 = smov 0  }
   0x3   :  { %s1541_s23 = smov 0   ;;  %s1543_s24 = smov 0  }
   0x4 LB: > { %s1558_s25 = sadd.s32 4294967295, %s1494_s24   ;;  %s1140_s26 = sadd.s32 4294967294, %s1494_s24   ;;  %s1494_s24 = sphi %s1543_s24, %s2187_s24   ;;  %s1490_s23 = sphi %s1541_s23, %s2186_s23   ;;  %s1486_s22 = sphi %s1539_s22, %s2185_s22   ;;  %s1482_s21 = sphi %s1537_s21, %s2184_s21  }
   0x5   : > { %s1562_s27 = sadd.s32 1, %s1494_s24   ;;  %s158_s28 = sadd.s32 1, %s1490_s23 }
   0x6   : > { %s155_s29 = ssub.s32 %s1494_s24, %s1562_s27  ;;  %p168_p0 = scmp.ne.s32.totalorder %s1490_s23, %s1486_s22 }
   0x7   : > { %p156_p1 = scmp.eq.s32.totalorder %s155_s29, 0  ;;  %p169_p2 = scmp.eq.s32.totalorder %s1558_s25, 1 }
   0x8   : > { %p174_p3 = scmp.ne.s32.totalorder %s1486_s22, %s1482_s21  ;;  %p175_p4 = scmp.eq.s32.totalorder %s1140_s26, 1 }
   0x9   : > { %s1573_s30 = scalar_select %p156_p1, %s1490_s23, %s158_s28  }
   0xa   : > { %p1575_p5 = por %p169_p2, %p168_p0  ;;  %p1579_p6 = por %p175_p4, %p174_p3 }
   0xb   : > { %p1141_p7 = scmp.ge.s32.totalorder %s1494_s24, 1  ;;  %p182_p8 = scmp.lt.s32.totalorder %s1494_s24, 3 }
   0xc   : > { %p1235_p9 = scmp.eq.s32.totalorder %s1558_s25, 0  ;;  %s193_s11 = sshll.u32 %s2176_s1, 4  ;;  %s194_s11 = int_to_ptr.hbm [resolvable:$true] %s193_s11 }
   0xd   : > { %p183_p10 = pnand %p1141_p7, %p182_p8  ;;  %s1496_s12 = smov [#allocation2]  }
   0xe   : > { %s195_s13 = sshll.u32 %s1496_s12, 4  ;;  %s1497_s14 = smov 64   ;;  %s196_s13 = int_to_ptr.vmem [resolvable:$true] %s195_s13 }
   0xf   : > { %p1227_p11 = pneg %p183_p10  ;;  %s1498_s15 = smov 4  }
  0x10   : > { %232 = sbr.rel (%p183_p10) target bundleno = 511 (0x1ff), region = 44 }
  0x11   : > { %p1228_p12 = pnand %p1235_p9, %p1227_p11 }
  0x13   : > { %1230 = dma.hbm_to_vmem [thread:$0]  (!%p1228_p12), %s194_s11, 1280, %s196_s13, [#allocation3], %s1497_s14, %s1497_s14, %s1498_s15  }
  0x15   : > { %1473 = dma.done.wait (%p1235_p9), [#allocation3], 1280  }
  0x16   : > { %1475 = vsyncadd (%p1235_p9), [#allocation3], 4294966016  ;;  %s1147_s16 = sshll.u32 %s1558_s25, 4  ;;  %v302_v0 = vlaneseq  ;;  %s1499_s26 = smov 32   ;;  %vm612_vm4 = vcmask 261120   ;;  %vm629_vm5 = vcmask 523264  }
  0x17   : > { %p264_p13 = scmp.lt.s32.totalorder %s1147_s16, 31  ;;  %s1500_s28 = smov 64   ;;  %vm646_vm6 = vcmask 785408   ;;  %vm1017_vm7 = vcmask 1041409   ;;  %vm1019_vm8 = vcmask 1042434   ;;  %vm1021_vm9 = vcmask 1043459  }
  0x18   : > { %v1596_v1 = vshrl.u32 %v302_v0, 7  ;;  %s1501_s29 = smov 96   ;;  %vm1023_vm10 = vcmask 1044484   ;;  %vm1025_vm11 = vcmask 1045509   ;;  %vm1027_vm12 = vcmask 1046534   ;;  %s260_s15 = sand.u32 1, %s1486_s22  }
  0x19   : > { %s2189_s16 = smov (!%p264_p13, %s1147_s16), 31  ;;  %vm1029_vm13 = vcmask 1047559   ;;  %s1054_s11 = scalar_lea.sflag [#allocation4], %s260_s15 }
  0x1a   : > { %s1148_s17 = sshll.u32 %s2189_s16, 3  ;;  %vm304_vm0 = vcmp.lt.s32.totalorder %v1596_v1, 7  ;;  %vm337_vm1 = vcmp.lt.s32.totalorder %v1596_v1, 6  ;;  %vm370_vm2 = vcmp.lt.s32.totalorder %v1596_v1, 5  ;;  %vm403_vm3 = vcmp.lt.s32.totalorder %v1596_v1, 4  ;;  %s1146_s16 = sshll.u32 %s260_s15, 3 }
  0x1b   : > { %s1601_s20 = scalar_lea.vmem %s2175_s0, %s1148_s17  ;;  %s1198_s17 = sshll.u32 %s1558_s25, 3 }
  0x1c   : > { %v1604_v2 = vld [vmem:[%s1601_s20 + $0x40] sm:$0xff]  ;;  %v1607_v3 = vld [vmem:[%s1601_s20 + $0x48] sm:$0xff]  ;;  %v1610_v4 = vld [vmem:[%s1601_s20 + $0x50] sm:$0xff] }
  0x1d   : > { %v294_v5 = vrot.slane %v1604_v2, 1  ;;  %v295_v6 = vrot.slane %v1607_v3, 1  ;;  %v296_v7 = vrot.slane %v1610_v4, 1  ;;  %v1618_v8 = vld [vmem:[%s1601_s20] sm:$0xff]  ;;  %v1621_v9 = vld [vmem:[%s1601_s20 + $0x8] sm:$0xff]  ;;  %v1624_v10 = vld [vmem:[%s1601_s20 + $0x10] sm:$0xff] }
  0x1e   : > { %v286_v11 = vrot.slane %v1618_v8, 1  ;;  %v287_v12 = vrot.slane %v1621_v9, 1  ;;  %v288_v13 = vrot.slane %v1624_v10, 1  ;;  %v329_v14 = vrot.slane %v1604_v2, 2  ;;  %v1659_v28 = vld [vmem:[%s1601_s20 + $0x58] sm:$0xff]  ;;  %v1669_v32 = vld [vmem:[%s1601_s20 + $0x60] sm:$0xff] }
  0x1f   : > { %v310_v15 = vsel %vm304_vm0, %v295_v6, %v296_v7  ;;  %v311_v16 = vsel %vm304_vm0, %v294_v5, %v295_v6  ;;  %v330_v17 = vrot.slane %v1607_v3, 2  ;;  %v331_v18 = vrot.slane %v1610_v4, 2  ;;  %v1704_v53 = vld [vmem:[%s1601_s20 + $0x18] sm:$0xff]  ;;  %v1707_v54 = vld [vmem:[%s1601_s20 + $0x20] sm:$0xff] }
  0x20   : > { %v1276_v19 = vpack.i.bf16 %v310_v15, %v311_v16  ;;  %v318_v20 = vsel %vm304_vm0, %v287_v12, %v288_v13  ;;  %v319_v21 = vsel %vm304_vm0, %v286_v11, %v287_v12  ;;  %v362_v22 = vrot.slane %v1604_v2, 3  ;;  %v1728_v12 = vld [vmem:[%s1601_s20 + $0x70] sm:$0xff] }
  0x21   : > { %v1286_v23 = vpack.i.bf16 %v318_v20, %v319_v21  ;;  %v363_v24 = vrot.slane %v1607_v3, 3  ;;  %v364_v25 = vrot.slane %v1610_v4, 3  ;;  %v343_v26 = vsel %vm337_vm1, %v330_v17, %v331_v18 }
  0x22   : > { %1277 = vrot.lane.b32.xlu0 %v1276_v19, %s1499_s26  ;;  %v344_v27 = vsel %vm337_vm1, %v329_v14, %v330_v17  ;;  %v321_v29 = vrot.slane %v1618_v8, 2  ;;  %v322_v33 = vrot.slane %v1621_v9, 2  ;;  %v297_v35 = vrot.slane %v1659_v28, 1 }
  0x23   : > { %1287 = vrot.lane.b32.xlu1 %v1286_v23, %s1499_s26  ;;  %v376_v30 = vsel %vm370_vm2, %v363_v24, %v364_v25  ;;  %v377_v31 = vsel %vm370_vm2, %v362_v22, %v363_v24  ;;  %v1281_v34 = vpack.i.bf16 %v343_v26, %v344_v27  ;;  %v323_v36 = vrot.slane %v1624_v10, 2 }
  0x24   : > { %v352_v37 = vsel %vm337_vm1, %v321_v29, %v322_v33  ;;  %v1291_v38 = vpack.i.bf16 %v376_v30, %v377_v31  ;;  %v298_v39 = vrot.slane %v1669_v32, 1  ;;  %v332_v40 = vrot.slane %v1659_v28, 2 }
  0x25   : > { %v333_v41 = vrot.slane %v1669_v32, 2  ;;  %v351_v42 = vsel %vm337_vm1, %v322_v33, %v323_v36  ;;  %v354_v43 = vrot.slane %v1618_v8, 3  ;;  %v355_v44 = vrot.slane %v1621_v9, 3 }
  0x26   : > { %v356_v45 = vrot.slane %v1624_v10, 3  ;;  %v1296_v46 = vpack.i.bf16 %v351_v42, %v352_v37  ;;  %v308_v47 = vsel %vm304_vm0, %v297_v35, %v298_v39  ;;  %v309_v48 = vsel %vm304_vm0, %v296_v7, %v297_v35  ;;  %v1725_v7 = vld [vmem:[%s1601_s20 + $0x68] sm:$0xff] }
  0x27   : > { %v341_v49 = vsel %vm337_vm1, %v332_v40, %v333_v41  ;;  %v342_v50 = vsel %vm337_vm1, %v331_v18, %v332_v40  ;;  %v385_v52 = vsel %vm370_vm2, %v354_v43, %v355_v44  ;;  %v1306_v55 = vpack.i.bf16 %v308_v47, %v309_v48  ;;  %v1210_v35 = vld [vmem:[#allocation2 + $0x48] sm:$0xff] }
  0x28   : > { %1297 = vrot.lane.b32.xlu2 %v1296_v46, %s1500_s28  ;;  %v384_v51 = vsel %vm370_vm2, %v355_v44, %v356_v45  ;;  %v1311_v56 = vpack.i.bf16 %v341_v49, %v342_v50  ;;  %v365_v57 = vrot.slane %v1659_v28, 3  ;;  %v366_v58 = vrot.slane %v1669_v32, 3  ;;  %842 = vmatpush.bf16.msra.mxu1 %v1210_v35  ;;  %v1209_v44 = vld [vmem:[#allocation2 + $0x40] sm:$0xff] }
  0x29   : > { %v1301_v59 = vpack.i.bf16 %v384_v51, %v385_v52  ;;  %v324_v60 = vrot.slane %v1704_v53, 2  ;;  %v325_v61 = vrot.slane %v1707_v54, 2  ;;  %v289_v62 = vrot.slane %v1704_v53, 1  ;;  %1219 = vmatpush.bf16.msra.mxu2 %v1210_v35 }
  0x2a   : > { %1282 = vrot.lane.b32.xlu0 %v1281_v34, %s1500_s28  ;;  %v290_v63 = vrot.slane %v1707_v54, 1  ;;  %v374_v0 = vsel %vm370_vm2, %v365_v57, %v366_v58  ;;  %v375_v6 = vsel %vm370_vm2, %v364_v25, %v365_v57  ;;  %v299_v20 = vrot.slane %v1725_v7, 1 }
  0x2b   : > { %1292 = vrot.lane.b32.xlu1 %v1291_v38, %s1501_s29  ;;  %v349_v15 = vsel %vm337_vm1, %v324_v60, %v325_v61  ;;  %v350_v16 = vsel %vm337_vm1, %v323_v36, %v324_v60  ;;  %v317_v18 = vsel %vm304_vm0, %v288_v13, %v289_v62  ;;  %v1321_v19 = vpack.i.bf16 %v374_v0, %v375_v6  ;;  %v1768_v38 = vld [vmem:[%s1601_s20 + $0x28] sm:$0xff]  ;;  %v1208_v0 = vld [vmem:[#allocation2 + $0x38] sm:$0xff] }
  0x2c   : > { %v316_v17 = vsel %vm304_vm0, %v289_v62, %v290_v63  ;;  %v300_v21 = vrot.slane %v1728_v12, 1  ;;  %v1326_v23 = vpack.i.bf16 %v349_v15, %v350_v16  ;;  %v334_v24 = vrot.slane %v1725_v7, 2  ;;  %843 = vmatpush.bf16.msra.mxu1 %v1209_v44  ;;  %v1813_v16 = vld [vmem:[%s1601_s20 + $0x78] sm:$0xff]  ;;  %787 = vmatpush.bf16.msra.mxu0 %v1208_v0 }
  0x2d   : > { %v335_v25 = vrot.slane %v1728_v12, 2  ;;  %v1316_v26 = vpack.i.bf16 %v316_v17, %v317_v18  ;;  %v357_v27 = vrot.slane %v1704_v53, 3  ;;  %v358_v30 = vrot.slane %v1707_v54, 3  ;;  %1220 = vmatpush.bf16.msra.mxu2 %v1209_v44  ;;  %v1207_v18 = vld [vmem:[#allocation2 + $0x30] sm:$0xff]  ;;  %1211 = vmatpush.bf16.msra.mxu3 %v1208_v0  ;;  %v1205_v44 = vld [vmem:[#allocation2 + $0x20] sm:$0xff] }
  0x2e   : > { %v306_v13 = vsel %vm304_vm0, %v299_v20, %v300_v21  ;;  %v307_v31 = vsel %vm304_vm0, %v298_v39, %v299_v20  ;;  %v340_v34 = vsel %vm337_vm1, %v333_v41, %v334_v24  ;;  %v387_v36 = vrot.slane %v1618_v8, 4  ;;  %v1779_v41 = vld [vmem:[%s1601_s20 + $0x30] sm:$0xff] }
  0x2f   : > { %v339_v33 = vsel %vm337_vm1, %v334_v24, %v335_v25  ;;  %v388_v37 = vrot.slane %v1621_v9, 4  ;;  %v382_v39 = vsel %vm370_vm2, %v357_v27, %v358_v30  ;;  %v383_v40 = vsel %vm370_vm2, %v356_v45, %v357_v27 }
  0x30   : > { %1302 = vrot.lane.b32.xlu2 %v1301_v59, %s1501_s29  ;;  %v389_v42 = vrot.slane %v1624_v10, 4  ;;  %v1336_v47 = vpack.i.bf16 %v306_v13, %v307_v31  ;;  %v367_v48 = vrot.slane %v1725_v7, 3  ;;  %v1341_v49 = vpack.i.bf16 %v339_v33, %v340_v34  ;;  %788 = vmatpush.bf16.msra.mxu0 %v1207_v18  ;;  %v1206_v31 = vld [vmem:[#allocation2 + $0x28] sm:$0xff] }
  0x31   : > { %v418_v46 = vsel %vm403_vm3, %v387_v36, %v388_v37  ;;  %v368_v50 = vrot.slane %v1728_v12, 3  ;;  %v326_v51 = vrot.slane %v1768_v38, 2  ;;  %v1331_v52 = vpack.i.bf16 %v382_v39, %v383_v40  ;;  %1212 = vmatpush.bf16.msra.mxu3 %v1207_v18  ;;  %v1856_v39 = vld [vmem:[%s1601_s20 + $0x38] sm:$0xff]  ;;  %s1064_s20 = scalar_lea.hbm %s2181_s6, %s1198_s17  ;;  %s1448_s17 = scalar_lea.hbm %s2181_s6, 16 }
  0x32   : > { %1307 = vrot.lane.b32.xlu0 %v1306_v55, %s1499_s26  ;;  %v417_v45 = vsel %vm403_vm3, %v388_v37, %v389_v42  ;;  %v327_v55 = vrot.slane %v1779_v41, 2  ;;  %v292_v57 = vrot.slane %v1779_v41, 1  ;;  %v373_v62 = vsel %vm370_vm2, %v366_v58, %v367_v48  ;;  %s1068_s10 = sshll.u32 %s1064_s20, 4  ;;  %s1069_s10 = int_to_ptr.hbm [resolvable:$true] %s1068_s10 }
  0x33   : > { %1312 = vrot.lane.b32.xlu1 %v1311_v56, %s1500_s28  ;;  %v291_v56 = vrot.slane %v1768_v38, 1  ;;  %v664_v59 = vpack.c.bf16 %v417_v45, %v418_v46  ;;  %v372_v60 = vsel %vm370_vm2, %v367_v48, %v368_v50  ;;  %v348_v15 = vsel %vm337_vm1, %v325_v61, %v326_v51  ;;  %s1442_s12 = sshra.s32 %s1069_s10, 4  ;;  %s1443_s12 = int_to_ptr.hbm [resolvable:$true] %s1442_s12 }
  0x34   : > { %v347_v6 = vsel %vm337_vm1, %v326_v51, %v327_v55  ;;  %v301_v61 = vrot.slane %v1813_v16, 1  ;;  %v336_v24 = vrot.slane %v1813_v16, 2  ;;  %v360_v27 = vrot.slane %v1779_v41, 3  ;;  %789 = vmatpush.bf16.msra.mxu0 %v1206_v31  ;;  %v1204_v51 = vld [vmem:[#allocation2 + $0x18] sm:$0xff]  ;;  %s1444_s25 = scalar_lea.hbm %s1443_s12, 8  ;;  %p1449_p3 = scmp.lt.s32.totalorder %s1443_s12, %s2181_s6 }
  0x35   : > { %v314_v58 = vsel %vm304_vm0, %v291_v56, %v292_v57  ;;  %v315_v17 = vsel %vm304_vm0, %v290_v63, %v291_v56  ;;  %1189 = vmatmul.msk.bf16.vlgmr.msra.gmra.mxu1 %vm612_vm4, %v664_v59  ;;  %v1356_v20 = vpack.i.bf16 %v347_v6, %v348_v15  ;;  %v390_v13 = vrot.slane %v1704_v53, 4  ;;  %1213 = vmatpush.bf16.msra.mxu3 %v1206_v31  ;;  %p1445_p0 = scmp.ne.s32.totalorder %s1443_s12, %s1444_s25  ;;  %p1450_p4 = scmp.lt.s32.totalorder %s1448_s17, %s1444_s25 }
  0x36   : > { %v391_v63 = vrot.slane %v1707_v54, 4  ;;  %v305_v33 = vsel %vm304_vm0, %v300_v21, %v301_v61  ;;  %v320_v34 = vsel %vm304_vm0, %v301_v61, %v286_v11  ;;  %v338_v35 = vsel %vm337_vm1, %v335_v25, %v336_v24 }
  0x37   : > { %v353_v37 = vsel %vm337_vm1, %v336_v24, %v321_v29  ;;  %v416_v25 = vsel %vm403_vm3, %v389_v42, %v390_v13  ;;  %v1366_v29 = vpack.i.bf16 %v320_v34, %v305_v33  ;;  %v328_v45 = vrot.slane %v1856_v39, 2  ;;  %p1446_p1 = pnand %p1445_p0, %p1575_p5  ;;  %p1451_p7 = por %p1450_p4, %p1449_p3 }
  0x38   : > { %1317 = vrot.lane.b32.xlu2 %v1316_v26, %s1499_s26  ;;  %v359_v26 = vrot.slane %v1768_v38, 3  ;;  %v415_v40 = vsel %vm403_vm3, %v390_v13, %v391_v63  ;;  %v1371_v46 = vpack.i.bf16 %v353_v37, %v338_v35  ;;  %790 = vmatpush.bf16.msra.mxu0 %v1205_v44  ;;  %v361_v0 = vrot.slane %v1856_v39, 3 }
  0x39   : > { %1214 = vmatpush.bf16.msra.mxu3 %v1205_v44  ;;  %v345_v56 = vsel %vm337_vm1, %v328_v45, %v329_v14  ;;  %v346_v59 = vsel %vm337_vm1, %v327_v55, %v328_v45  ;;  %v392_v55 = vrot.slane %v1768_v38, 4  ;;  %v393_v6 = vrot.slane %v1779_v41, 4  ;;  %p1447_p2 = pneg %p1446_p1 }
  0x3a   : > { %1322 = vrot.lane.b32.xlu0 %v1321_v19, %s1501_s29  ;;  %v1351_v19 = vpack.i.bf16 %v372_v60, %v373_v62  ;;  %v380_v21 = vsel %vm370_vm2, %v359_v26, %v360_v27  ;;  %v381_v11 = vsel %vm370_vm2, %v358_v30, %v359_v26  ;;  %v293_v30 = vrot.slane %v1856_v39, 1 }
  0x3b   : > { %1327 = vrot.lane.b32.xlu1 %v1326_v23, %s1500_s28  ;;  %v1346_v23 = vpack.i.bf16 %v314_v58, %v315_v17  ;;  %v1361_v48 = vpack.i.bf16 %v380_v21, %v381_v11  ;;  %v1386_v60 = vpack.i.bf16 %v345_v56, %v346_v59  ;;  %v413_v15 = vsel %vm403_vm3, %v392_v55, %v393_v6  ;;  %p1452_p8 = pnand %p1451_p7, %p1447_p2 }
  0x3c   : > { %791 = vmatpush.bf16.msra.mxu0 %v1204_v51  ;;  %v414_v58 = vsel %vm403_vm3, %v391_v63, %v392_v55  ;;  %v395_v61 = vrot.slane %v1604_v2, 4  ;;  %v396_v63 = vrot.slane %v1607_v3, 4  ;;  %v397_v31 = vrot.slane %v1610_v4, 4 }
  0x3d   : > { %1215 = vmatpush.bf16.msra.mxu3 %v1204_v51  ;;  %v668_v18 = vpack.c.bf16 %v413_v15, %v414_v58  ;;  %v398_v35 = vrot.slane %v1659_v28, 4  ;;  %v399_v37 = vrot.slane %v1669_v32, 4 }
  0x3e   : > { %v409_v33 = vsel %vm403_vm3, %v396_v63, %v397_v31  ;;  %v410_v34 = vsel %vm403_vm3, %v395_v61, %v396_v63 }
  0x3f   : > { %v672_v21 = vpack.c.bf16 %v409_v33, %v410_v34  ;;  %v407_v11 = vsel %vm403_vm3, %v398_v35, %v399_v37 }
  0x40   : > { %1332 = vrot.lane.b32.xlu2 %v1331_v52, %s1501_s29 }
  0x42   : > { %1337 = vrot.lane.b32.xlu0 %v1336_v47, %s1499_s26  ;;  %v369_v47 = vrot.slane %v1813_v16, 3 }
  0x43   : > { %1342 = vrot.lane.b32.xlu1 %v1341_v49, %s1500_s28  ;;  %v666_v49 = vpack.c.bf16 %v415_v40, %v416_v25  ;;  %v408_v40 = vsel %vm403_vm3, %v397_v31, %v398_v35 }
  0x44   : > { %v371_v42 = vsel %vm370_vm2, %v368_v50, %v369_v47  ;;  %v386_v52 = vsel %vm370_vm2, %v369_v47, %v354_v43  ;;  %v312_v50 = vsel %vm304_vm0, %v293_v30, %v294_v5  ;;  %v313_v43 = vsel %vm304_vm0, %v292_v57, %v293_v30 }
  0x45   : > { %1190 = vmatmul.msk.bf16.gmra.mxu1 %vm612_vm4, %v666_v49  ;;  %v1381_v14 = vpack.i.bf16 %v386_v52, %v371_v42  ;;  %v1376_v62 = vpack.i.bf16 %v312_v50, %v313_v43  ;;  %v378_v5 = vsel %vm370_vm2, %v361_v0, %v362_v22  ;;  %v379_v57 = vsel %vm370_vm2, %v360_v27, %v361_v0 }
  0x46   : > { %v1391_v17 = vpack.i.bf16 %v378_v5, %v379_v57  ;;  %v394_v22 = vrot.slane %v1856_v39, 4  ;;  %v674_v25 = vpack.c.bf16 %v407_v11, %v408_v40  ;;  %v400_v43 = vrot.slane %v1725_v7, 4 }
  0x48   : > { %1347 = vrot.lane.b32.xlu2 %v1346_v23, %s1499_s26  ;;  %v1201_v23 = vld [vmem:[#allocation2] sm:$0xff]  ;;  %v411_v24 = vsel %vm403_vm3, %v394_v22, %v395_v61  ;;  %v412_v26 = vsel %vm403_vm3, %v393_v6, %v394_v22  ;;  %1194 = vmatmul.msk.bf16.vlgmr.msra.gmra.mxu2 %vm612_vm4, %v674_v25  ;;  %v406_v5 = vsel %vm403_vm3, %v399_v37, %v400_v43 }
  0x49   : > { %v670_v27 = vpack.c.bf16 %v411_v24, %v412_v26 }
  0x4a   : > { %1352 = vrot.lane.b32.xlu0 %v1351_v19, %s1501_s29  ;;  %v1203_v19 = vld [vmem:[#allocation2 + $0x10] sm:$0xff] }
  0x4b   : > { %1357 = vrot.lane.b32.xlu1 %v1356_v20, %s1500_s28  ;;  %792 = vmatpush.bf16.msra.mxu0 %v1203_v19  ;;  %v1202_v20 = vld [vmem:[#allocation2 + $0x8] sm:$0xff] }
  0x4c   : > { %1216 = vmatpush.bf16.msra.mxu3 %v1203_v19 }
  0x4f   : > { %793 = vmatpush.bf16.msra.mxu0 %v1202_v20 }
  0x50   : > { %1362 = vrot.lane.b32.xlu2 %v1361_v48, %s1501_s29  ;;  %1217 = vmatpush.bf16.msra.mxu3 %v1202_v20 }
  0x52   : > { %1367 = vrot.lane.b32.xlu0 %v1366_v29, %s1499_s26 }
  0x53   : > { %1372 = vrot.lane.b32.xlu1 %v1371_v46, %s1500_s28  ;;  %794 = vmatpush.bf16.msra.mxu0 %v1201_v23 }
  0x54   : > { %1218 = vmatpush.bf16.msra.mxu3 %v1201_v23 }
  0x55   : > { %1191 = vmatmul.msk.bf16.gmra.mxu1 %vm612_vm4, %v668_v18 }
  0x58   : > { %1377 = vrot.lane.b32.xlu2 %v1376_v62, %s1499_s26 }
  0x5a   : > { %1382 = vrot.lane.b32.xlu0 %v1381_v14, %s1501_s29  ;;  %v401_v14 = vrot.slane %v1728_v12, 4 }
  0x5b   : > { %1387 = vrot.lane.b32.xlu1 %v1386_v60, %s1500_s28 }
  0x60   : > { %1392 = vrot.lane.b32.xlu2 %v1391_v17, %s1501_s29  ;;  %s262_s29 = scalar_lea.vmem [#allocation5], %s1146_s16 }
  0x61   : > { %s1066_s9 = sshll.u32 %s262_s29, 4  ;;  %s1067_s9 = int_to_ptr.vmem [resolvable:$true] %s1066_s9 }
  0x65   : > { %1192 = vmatmul.msk.bf16.gmra.mxu1 %vm612_vm4, %v670_v27 }
  0x75   : > { %1193 = vmatmul.msk.bf16.gmra.mxu1 %vm612_vm4, %v672_v21 }
  0x82   : > { %v1298_v13 = vpop.permute.xlu2 %1297 }
  0x83   : > { %v1300_v46 = vunpack.i.h.bf16 %v1298_v13  ;;  %v1299_v47 = vunpack.i.l.bf16 %v1298_v13 }
  0x8a   : > { %v1303_v44 = vpop.permute.xlu2 %1302 }
  0x8b   : > { %v1305_v49 = vunpack.i.h.bf16 %v1303_v44  ;;  %v1304_v51 = vunpack.i.l.bf16 %v1303_v44 }
  0x92   : > { %v1318_v56 = vpop.permute.xlu2 %1317 }
  0x93   : > { %v1320_v21 = vunpack.i.h.bf16 %v1318_v56  ;;  %v1319_v11 = vunpack.i.l.bf16 %v1318_v56 }
  0x94   : > { %v1278_v29 = vpop.permute.xlu0 %1277 }
  0x95   : > { %v1288_v48 = vpop.permute.xlu1 %1287  ;;  %v1280_v60 = vunpack.i.h.bf16 %v1278_v29  ;;  %v1279_v62 = vunpack.i.l.bf16 %v1278_v29  ;;  %v616_v1 = vsel %vm612_vm4, %v1704_v53, %v1320_v21 }
  0x96   : > { %v1290_v45 = vunpack.i.h.bf16 %v1288_v48  ;;  %v1289_v30 = vunpack.i.l.bf16 %v1288_v48 }
  0x97   : > { %v622_v19 = vsel %vm612_vm4, %v1607_v3, %v1280_v60  ;;  %v621_v20 = vsel %vm612_vm4, %v1604_v2, %v1279_v62  ;;  %v402_v2 = vrot.slane %v1813_v16, 4 }
  0x98   : > { %v614_v42 = vsel %vm612_vm4, %v1621_v9, %v1290_v45  ;;  %v613_v52 = vsel %vm612_vm4, %v1618_v8, %v1289_v30  ;;  %v405_v9 = vsel %vm403_vm3, %v400_v43, %v401_v14  ;;  %v615_v8 = vsel %vm612_vm4, %v1624_v10, %v1319_v11 }
  0x99   : > { %v630_v59 = vsel %vm629_vm5, %v613_v52, %v1299_v47  ;;  %v631_v50 = vsel %vm629_vm5, %v614_v42, %v1300_v46  ;;  %v676_v15 = vpack.c.bf16 %v405_v9, %v406_v5  ;;  %v404_v44 = vsel %vm403_vm3, %v401_v14, %v402_v2 }
  0x9a   : > { %v647_v0 = vsel %vm646_vm6, %v630_v59, %v1304_v51  ;;  %v648_v55 = vsel %vm646_vm6, %v631_v50, %v1305_v49  ;;  %v1333_v63 = vpop.permute.xlu2 %1332  ;;  %v419_v29 = vsel %vm403_vm3, %v402_v2, %v387_v36 }
  0x9b   : > { %v663_v6 = vpack.c.bf16 %v648_v55, %v647_v0  ;;  %1195 = vmatmul.msk.bf16.gmra.mxu2 %vm612_vm4, %v676_v15  ;;  %v678_v48 = vpack.c.bf16 %v419_v29, %v404_v44  ;;  %v1335_v51 = vunpack.i.h.bf16 %v1333_v63  ;;  %v1334_v42 = vunpack.i.l.bf16 %v1333_v63 }
  0x9c   : > { %v1283_v57 = vpop.permute.xlu0 %1282 }
  0x9d   : > { %v1285_v58 = vunpack.i.h.bf16 %v1283_v57  ;;  %v1284_v17 = vunpack.i.l.bf16 %v1283_v57  ;;  %v1293_v18 = vpop.permute.xlu1 %1292  ;;  %795 = vmatmul.bf16.vlgmr.msra.gmra.mxu0 %v663_v6 }
  0x9e   : > { %v1295_v22 = vunpack.i.h.bf16 %v1293_v18  ;;  %v1294_v61 = vunpack.i.l.bf16 %v1293_v18 }
  0x9f   : > { %v638_v23 = vsel %vm629_vm5, %v621_v20, %v1284_v17  ;;  %v639_v24 = vsel %vm629_vm5, %v622_v19, %v1285_v58 }
  0xa0   : > { %v655_v26 = vsel %vm646_vm6, %v638_v23, %v1294_v61  ;;  %v656_v27 = vsel %vm646_vm6, %v639_v24, %v1295_v22 }
  0xa1   : > { %v671_v13 = vpack.c.bf16 %v656_v27, %v655_v26 }
  0xa2   : > { %v1348_v47 = vpop.permute.xlu2 %1347 }
  0xa3   : > { %815 = vmatmul.bf16.vlgmr.msra.gmra.mxu3 %v671_v13  ;;  %v1350_v17 = vunpack.i.h.bf16 %v1348_v47  ;;  %v1349_v18 = vunpack.i.l.bf16 %v1348_v47 }
  0xa4   : > { %v1308_v31 = vpop.permute.xlu0 %1307 }
  0xa5   : > { %v1313_v3 = vpop.permute.xlu1 %1312  ;;  %v1310_v33 = vunpack.i.h.bf16 %v1308_v31  ;;  %v1309_v34 = vunpack.i.l.bf16 %v1308_v31 }
  0xa6   : > { %v1315_v35 = vunpack.i.h.bf16 %v1313_v3  ;;  %v1314_v37 = vunpack.i.l.bf16 %v1313_v3 }
  0xa7   : > { %v624_v40 = vsel %vm612_vm4, %v1659_v28, %v1310_v33  ;;  %v623_v25 = vsel %vm612_vm4, %v1610_v4, %v1309_v34 }
  0xa8   : > { %v640_v4 = vsel %vm629_vm5, %v623_v25, %v1314_v37  ;;  %v641_v56 = vsel %vm629_vm5, %v624_v40, %v1315_v35 }
  0xaa   : > { %v1363_v6 = vpop.permute.xlu2 %1362 }
  0xab   : > { %1196 = vmatmul.msk.bf16.gmra.mxu2 %vm612_vm4, %v678_v48  ;;  %v1365_v23 = vunpack.i.h.bf16 %v1363_v6  ;;  %v1364_v24 = vunpack.i.l.bf16 %v1363_v6 }
  0xac   : > { %v1323_v46 = vpop.permute.xlu0 %1322 }
  0xad   : > { %v1325_v45 = vunpack.i.h.bf16 %v1323_v46  ;;  %v1324_v30 = vunpack.i.l.bf16 %v1323_v46  ;;  %v1328_v49 = vpop.permute.xlu1 %1327 }
  0xae   : > { %v1330_v28 = vunpack.i.h.bf16 %v1328_v49  ;;  %v1329_v52 = vunpack.i.l.bf16 %v1328_v49 }
  0xaf   : > { %v657_v36 = vsel %vm646_vm6, %v640_v4, %v1324_v30  ;;  %v658_v59 = vsel %vm646_vm6, %v641_v56, %v1325_v45 }
  0xb0   : > { %v632_v50 = vsel %vm629_vm5, %v615_v8, %v1329_v52  ;;  %v633_v43 = vsel %vm629_vm5, %v616_v1, %v1330_v28  ;;  %v673_v14 = vpack.c.bf16 %v658_v59, %v657_v36 }
  0xb1   : > { %v649_v60 = vsel %vm646_vm6, %v632_v50, %v1334_v42  ;;  %v650_v62 = vsel %vm646_vm6, %v633_v43, %v1335_v51 }
  0xb2   : > { %v665_v0 = vpack.c.bf16 %v650_v62, %v649_v60  ;;  %v1378_v35 = vpop.permute.xlu2 %1377 }
  0xb3   : > { %820 = vmatmul.bf16.gmra.mxu3 %v673_v14  ;;  %v1380_v45 = vunpack.i.h.bf16 %v1378_v35  ;;  %v1379_v30 = vunpack.i.l.bf16 %v1378_v35 }
  0xb4   : > { %800 = vmatmul.bf16.gmra.mxu0 %v665_v0  ;;  %v1338_v53 = vpop.permute.xlu0 %1337 }
  0xb5   : > { %v1343_v55 = vpop.permute.xlu1 %1342  ;;  %v1340_v10 = vunpack.i.h.bf16 %v1338_v53  ;;  %v1339_v9 = vunpack.i.l.bf16 %v1338_v53 }
  0xb6   : > { %v1345_v5 = vunpack.i.h.bf16 %v1343_v55  ;;  %v1344_v57 = vunpack.i.l.bf16 %v1343_v55 }
  0xb7   : > { %v626_v15 = vsel %vm612_vm4, %v1725_v7, %v1340_v10  ;;  %v625_v58 = vsel %vm612_vm4, %v1669_v32, %v1339_v9  ;;  %v618_v7 = vsel %vm612_vm4, %v1768_v38, %v1350_v17  ;;  %v617_v32 = vsel %vm612_vm4, %v1707_v54, %v1349_v18 }
  0xb8   : > { %v642_v13 = vsel %vm629_vm5, %v625_v58, %v1344_v57  ;;  %v643_v63 = vsel %vm629_vm5, %v626_v15, %v1345_v5 }
  0xba   : > { %v1393_v46 = vpop.permute.xlu2 %1392 }
  0xbb   : > { %v1395_v52 = vunpack.i.h.bf16 %v1393_v46  ;;  %v1394_v4 = vunpack.i.l.bf16 %v1393_v46  ;;  %v996_v46 = vld [vmem:[%s2177_s2 + $0x38] sm:$0xff] }
  0xbc   : > { %v1353_v19 = vpop.permute.xlu0 %1352 }
  0xbd   : > { %v1355_v20 = vunpack.i.h.bf16 %v1353_v19  ;;  %v1354_v22 = vunpack.i.l.bf16 %v1353_v19  ;;  %v1358_v61 = vpop.permute.xlu1 %1357  ;;  %v1004_v19 = vld [vmem:[%s2177_s2 + $0x78] sm:$0xff] }
  0xbe   : > { %v1360_v26 = vunpack.i.h.bf16 %v1358_v61  ;;  %v1359_v27 = vunpack.i.l.bf16 %v1358_v61  ;;  %1032 = vmatpush.msrb.mxu2 %v1004_v19 }
  0xbf   : > { %v659_v31 = vsel %vm646_vm6, %v642_v13, %v1354_v22  ;;  %v660_v3 = vsel %vm646_vm6, %v643_v63, %v1355_v20  ;;  %v1001_v13 = vld [vmem:[%s2177_s2 + $0x60] sm:$0xff] }
  0xc0   : > { %v634_v33 = vsel %vm629_vm5, %v617_v32, %v1359_v27  ;;  %v635_v34 = vsel %vm629_vm5, %v618_v7, %v1360_v26  ;;  %v675_v2 = vpack.c.bf16 %v660_v3, %v659_v31  ;;  %v1003_v26 = vld [vmem:[%s2177_s2 + $0x70] sm:$0xff]  ;;  %v1002_v27 = vld [vmem:[%s2177_s2 + $0x68] sm:$0xff]  ;;  %v1000_v32 = vld [vmem:[%s2177_s2 + $0x58] sm:$0xff] }
  0xc1   : > { %v651_v37 = vsel %vm646_vm6, %v634_v33, %v1364_v24  ;;  %v652_v21 = vsel %vm646_vm6, %v635_v34, %v1365_v23  ;;  %1033 = vmatpush.msrb.mxu2 %v1003_v26  ;;  %v999_v31 = vld [vmem:[%s2177_s2 + $0x50] sm:$0xff]  ;;  %v2040_v3 = vld [vmem:[%s2178_s3] ss:$0 sm:$0xff] }
  0xc2   : > { %v667_v11 = vpack.c.bf16 %v652_v21, %v651_v37  ;;  %v998_v37 = vld [vmem:[%s2177_s2 + $0x48] sm:$0xff] }
  0xc3   : > { %825 = vmatmul.bf16.gmra.mxu3 %v675_v2  ;;  %1034 = vmatpush.msrb.mxu2 %v1002_v27 }
  0xc4   : > { %805 = vmatmul.bf16.gmra.mxu0 %v667_v11  ;;  %v1368_v38 = vpop.permute.xlu0 %1367 }
  0xc5   : > { %v1373_v40 = vpop.permute.xlu1 %1372  ;;  %v1370_v54 = vunpack.i.h.bf16 %v1368_v38  ;;  %v1369_v25 = vunpack.i.l.bf16 %v1368_v38  ;;  %1035 = vmatpush.msrb.mxu2 %v1001_v13  ;;  %v997_v38 = vld [vmem:[%s2177_s2 + $0x40] sm:$0xff] }
  0xc6   : > { %v1375_v44 = vunpack.i.h.bf16 %v1373_v40  ;;  %v1374_v29 = vunpack.i.l.bf16 %v1373_v40 }
  0xc7   : > { %v628_v47 = vsel %vm612_vm4, %v1813_v16, %v1370_v54  ;;  %v627_v48 = vsel %vm612_vm4, %v1728_v12, %v1369_v25  ;;  %v620_v16 = vsel %vm612_vm4, %v1856_v39, %v1380_v45  ;;  %v619_v12 = vsel %vm612_vm4, %v1779_v41, %v1379_v30  ;;  %v845_v39 = vpop.f32.mrf.mxu1  ;;  %1036 = vmatpush.msrb.mxu2 %v1000_v32 }
  0xc8   : > { %v644_v8 = vsel %vm629_vm5, %v627_v48, %v1374_v29  ;;  %v645_v36 = vsel %vm629_vm5, %v628_v47, %v1375_v44 }
  0xc9   : > { %1037 = vmatpush.msrb.mxu2 %v999_v31 }
  0xcb   : > { %v2015_v18 = vpop.f32.mrf.mxu2  ;;  %1038 = vmatpush.msrb.mxu2 %v998_v37  ;;  %v909_v37 = vld [vmem:[%s2180_s5 + $0x40] sm:$0xff] }
  0xcc   : > { %v1383_v49 = vpop.permute.xlu0 %1382 }
  0xcd   : > { %v1385_v51 = vunpack.i.h.bf16 %v1383_v49  ;;  %v1384_v42 = vunpack.i.l.bf16 %v1383_v49  ;;  %v1388_v28 = vpop.permute.xlu1 %1387  ;;  %1039 = vmatpush.msrb.mxu2 %v997_v38  ;;  %v911_v38 = vld [vmem:[%s2180_s5 + $0x50] sm:$0xff] }
  0xce   : > { %v1390_v56 = vunpack.i.h.bf16 %v1388_v28  ;;  %v1389_v1 = vunpack.i.l.bf16 %v1388_v28 }
  0xcf   : > { %v661_v59 = vsel %vm646_vm6, %v644_v8, %v1384_v42  ;;  %v662_v50 = vsel %vm646_vm6, %v645_v36, %v1385_v51  ;;  %v847_v55 = vpop.f32.mrf.mxu1  ;;  %1040 = vmatpush.msrb.mxu2 %v996_v46  ;;  %v995_v42 = vld [vmem:[%s2177_s2 + $0x30] sm:$0xff]  ;;  %v904_v36 = vld [vmem:[%s2180_s5 + $0x18] sm:$0xff] }
  0xd0   : > { %v636_v43 = vsel %vm629_vm5, %v619_v12, %v1389_v1  ;;  %v637_v14 = vsel %vm629_vm5, %v620_v16, %v1390_v56  ;;  %v677_v60 = vpack.c.bf16 %v662_v50, %v661_v59  ;;  %v994_v16 = vld [vmem:[%s2177_s2 + $0x28] sm:$0xff] }
  0xd1   : > { %v653_v62 = vsel %vm646_vm6, %v636_v43, %v1394_v4  ;;  %v654_v0 = vsel %vm646_vm6, %v637_v14, %v1395_v52  ;;  %1041 = vmatpush.msrb.mxu2 %v995_v42  ;;  %v902_v12 = vld [vmem:[%s2180_s5 + $0x8] sm:$0xff] }
  0xd2   : > { %v669_v53 = vpack.c.bf16 %v654_v0, %v653_v62  ;;  %v903_v0 = vld [vmem:[%s2180_s5 + $0x10] sm:$0xff] }
  0xd3   : > { %830 = vmatmul.bf16.gmra.mxu3 %v677_v60  ;;  %v872_v23 = vpop.f32.mrf.mxu2  ;;  %1042 = vmatpush.msrb.mxu2 %v994_v16 }
  0xd4   : > { %810 = vmatmul.bf16.gmra.mxu0 %v669_v53 }
  0xd7   : > { %v850_v6 = vpop.f32.mrf.mxu1 }
  0xdf   : > { %v852_v41 = vpop.f32.mrf.mxu1 }
  0xe7   : > { %v855_v10 = vpop.f32.mrf.mxu1 }
  0xef   : > { %v2011_v5 = vpop.f32.mrf.mxu1 }
  0xf7   : > { %v2013_v58 = vpop.f32.mrf.mxu1 }
  0xff   : > { %v2020_v22 = vpop.f32.mrf.mxu1 }
 0x107   : > { %v865_v63 = vpop.f32.mrf.mxu1 }
 0x10f   : > { %v867_v48 = vpop.f32.mrf.mxu1 }
 0x11a   : > { %v796_v9 = vpop.f32.mrf.mxu0 }
 0x11b   : > { %v797_v40 = vadd.f32 %v2040_v3, %v796_v9  ;;  %v905_v9 = vld [vmem:[%s2180_s5 + $0x20] sm:$0xff] }
 0x11d   : > { %v846_v28 = vadd.f32 %v845_v39, %v797_v40  ;;  %v906_v39 = vld [vmem:[%s2180_s5 + $0x28] sm:$0xff] }
 0x11e   : > { %v875_v2 = vpop.f32.mrf.mxu2 }
 0x122   : > { %v798_v15 = vpop.f32.mrf.mxu0 }
 0x123   : > { %v799_v35 = vadd.f32 %v2040_v3, %v798_v15  ;;  %v992_v15 = vld [vmem:[%s2177_s2 + $0x18] sm:$0xff] }
 0x125   : > { %v848_v44 = vadd.f32 %v847_v55, %v799_v35  ;;  %v993_v55 = vld [vmem:[%s2177_s2 + $0x20] sm:$0xff] }
 0x126   : > { %v816_v57 = vpop.f32.mrf.mxu3  ;;  %v877_v60 = vpop.f32.mrf.mxu2  ;;  %1043 = vmatpush.msrb.mxu2 %v993_v55 }
 0x127   : > { %v817_v30 = vadd.f32 %v2040_v3, %v816_v57  ;;  %v886_v1 = vmax.f32 %v848_v44, 0.0  ;;  %v989_v44 = vld [vmem:[%s2177_s2] sm:$0xff] }
 0x128   : > { %1044 = vmatpush.msrb.mxu2 %v992_v15 }
 0x129   : > { %v866_v62 = vadd.f32 %v865_v63, %v817_v30  ;;  %v918_v19 = vmul.f32 %v902_v12, %v886_v1  ;;  %v913_v30 = vld [vmem:[%s2180_s5 + $0x60] sm:$0xff] }
 0x12b   : > { %v893_v63 = vmax.f32 %v866_v62, 0.0 }
 0x12e   : > { %v818_v17 = vpop.f32.mrf.mxu3 }
 0x12f   : > { %v819_v29 = vadd.f32 %v2040_v3, %v818_v17  ;;  %v901_v17 = vld [vmem:[%s2180_s5] sm:$0xff] }
 0x131   : > { %v801_v20 = vpop.f32.mrf.mxu0  ;;  %v868_v8 = vadd.f32 %v867_v48, %v819_v29 }
 0x132   : > { %v802_v21 = vadd.f32 %v2040_v3, %v801_v20 }
 0x133   : > { %v894_v20 = vmax.f32 %v868_v8, 0.0 }
 0x134   : > { %v851_v47 = vadd.f32 %v850_v6, %v802_v21  ;;  %v885_v6 = vmax.f32 %v846_v28, 0.0  ;;  %v880_v28 = vpop.f32.mrf.mxu2 }
 0x136   : > { %v821_v61 = vpop.f32.mrf.mxu3  ;;  %v887_v59 = vmax.f32 %v851_v47, 0.0  ;;  %v917_v35 = vmul.f32 %v901_v17, %v885_v6  ;;  %v907_v6 = vld [vmem:[%s2180_s5 + $0x30] sm:$0xff] }
 0x137   : > { %v822_v52 = vadd.f32 %v2040_v3, %v821_v61  ;;  %v991_v61 = vld [vmem:[%s2177_s2 + $0x10] sm:$0xff] }
 0x138   : > { %1045 = vmatpush.msrb.mxu2 %v991_v61  ;;  %v933_v29 = vmax.f32 %v917_v35, %v918_v19 }
 0x139   : > { %v803_v24 = vpop.f32.mrf.mxu0 }
 0x13a   : > { %v804_v34 = vadd.f32 %v2040_v3, %v803_v24  ;;  %v910_v24 = vld [vmem:[%s2180_s5 + $0x48] sm:$0xff]  ;;  %v934_v1 = vrot.slane %v933_v29, 4 }
 0x13c   : > { %v853_v54 = vadd.f32 %v852_v41, %v804_v34  ;;  %v871_v41 = vadd.f32 %v2015_v18, %v822_v52  ;;  %v990_v34 = vld [vmem:[%s2177_s2 + $0x8] sm:$0xff] }
 0x13d   : > { %1046 = vmatpush.msrb.mxu2 %v990_v34 }
 0x13e   : > { %v823_v7 = vpop.f32.mrf.mxu3  ;;  %v888_v4 = vmax.f32 %v853_v54, 0.0 }
 0x13f   : > { %v824_v45 = vadd.f32 %v2040_v3, %v823_v7  ;;  %v912_v7 = vld [vmem:[%s2180_s5 + $0x58] sm:$0xff]  ;;  %1047 = vmatpush.msrb.mxu2 %v989_v44 }
 0x141   : > { %v806_v33 = vpop.f32.mrf.mxu0  ;;  %v873_v50 = vadd.f32 %v872_v23, %v824_v45  ;;  %v919_v23 = vmul.f32 %v903_v0, %v887_v59  ;;  %v925_v45 = vmul.f32 %v909_v37, %v893_v63  ;;  %v935_v0 = vmax.f32 %v933_v29, %v934_v1  ;;  %v915_v63 = vld [vmem:[%s2180_s5 + $0x70] sm:$0xff] }
 0x142   : > { %v807_v11 = vadd.f32 %v2040_v3, %v806_v33 }
 0x143   : > { %v896_v26 = vmax.f32 %v873_v50, 0.0 }
 0x144   : > { %v856_v49 = vadd.f32 %v855_v10, %v807_v11  ;;  %v920_v10 = vmul.f32 %v904_v36, %v888_v4  ;;  %v926_v11 = vmul.f32 %v910_v24, %v894_v20  ;;  %v936_v20 = vrot.slane %v935_v0, 2 }
 0x145   : > { %v928_v46 = vmul.f32 %v912_v7, %v896_v26 }
 0x146   : > { %v826_v25 = vpop.f32.mrf.mxu3  ;;  %v889_v53 = vmax.f32 %v856_v49, 0.0  ;;  %v940_v21 = vmax.f32 %v919_v23, %v920_v10  ;;  %v961_v4 = vmax.f32 %v925_v45, %v926_v11  ;;  %v882_v23 = vpop.f32.mrf.mxu2  ;;  %v937_v34 = vmax.f32 %v935_v0, %v936_v20 }
 0x147   : > { %v827_v43 = vadd.f32 %v2040_v3, %v826_v25  ;;  %v914_v25 = vld [vmem:[%s2180_s5 + $0x68] sm:$0xff] }
 0x148   : > { %v921_v32 = vmul.f32 %v905_v9, %v889_v53  ;;  %v938_v29 = vrot.slane %v937_v34, 1 }
 0x149   : > { %v808_v51 = vpop.f32.mrf.mxu0  ;;  %v876_v27 = vadd.f32 %v875_v2, %v827_v43  ;;  %v895_v2 = vmax.f32 %v871_v41, 0.0 }
 0x14a   : > { %v809_v56 = vadd.f32 %v2040_v3, %v808_v51  ;;  %v941_v51 = vrot.slane %v940_v21, 4 }
 0x14b   : > { %v897_v47 = vmax.f32 %v876_v27, 0.0  ;;  %v927_v49 = vmul.f32 %v911_v38, %v895_v2 }
 0x14c   : > { %v858_v14 = vadd.f32 %v2011_v5, %v809_v56  ;;  %v942_v50 = vmax.f32 %v940_v21, %v941_v51 }
 0x14d   : > { %v968_v8 = vmax.f32 %v927_v49, %v928_v46  ;;  %v929_v36 = vmul.f32 %v913_v30, %v897_v47 }
 0x14e   : > { %v890_v5 = vmax.f32 %v858_v14, 0.0  ;;  %v828_v57 = vpop.f32.mrf.mxu3  ;;  %v943_v10 = vrot.slane %v942_v50, 2 }
 0x14f   : > { %v829_v18 = vadd.f32 %v2040_v3, %v828_v57  ;;  %v969_v53 = vrot.slane %v968_v8, 4 }
 0x150   : > { %v922_v13 = vmul.f32 %v906_v39, %v890_v5  ;;  %v944_v27 = vmax.f32 %v942_v50, %v943_v10 }
 0x151   : > { %v878_v31 = vadd.f32 %v877_v60, %v829_v18  ;;  %v811_v33 = vpop.f32.mrf.mxu0  ;;  %v962_v60 = vrot.slane %v961_v4, 4  ;;  %v970_v18 = vmax.f32 %v968_v8, %v969_v53 }
 0x152   : > { %v947_v40 = vmax.f32 %v921_v32, %v922_v13  ;;  %v812_v48 = vadd.f32 %v2040_v3, %v811_v33  ;;  %v916_v32 = vld [vmem:[%s2180_s5 + $0x78] sm:$0xff]  ;;  %v945_v11 = vrot.slane %v944_v27, 1 }
 0x153   : > { %v898_v54 = vmax.f32 %v878_v31, 0.0  ;;  %v963_v15 = vmax.f32 %v961_v4, %v962_v60  ;;  %v971_v35 = vrot.slane %v970_v18, 2 }
 0x154   : > { %v948_v56 = vrot.slane %v947_v40, 4  ;;  %v861_v16 = vadd.f32 %v2013_v58, %v812_v48  ;;  %v908_v58 = vld [vmem:[%s2180_s5 + $0x38] sm:$0xff]  ;;  %v946_v45 = vmax.f32 %v944_v27, %v945_v11 }
 0x155   : > { %v930_v42 = vmul.f32 %v914_v25, %v898_v54  ;;  %v964_v31 = vrot.slane %v963_v15, 2  ;;  %v972_v46 = vmax.f32 %v970_v18, %v971_v35 }
 0x156   : > { %v831_v52 = vpop.f32.mrf.mxu3  ;;  %v949_v62 = vmax.f32 %v947_v40, %v948_v56  ;;  %v891_v39 = vmax.f32 %v861_v16, 0.0 }
 0x157   : > { %v832_v12 = vadd.f32 %v2040_v3, %v831_v52  ;;  %v975_v43 = vmax.f32 %v929_v36, %v930_v42  ;;  %v965_v54 = vmax.f32 %v963_v15, %v964_v31  ;;  %v939_v52 = vmax.f32 %v937_v34, %v938_v29 }
 0x158   : > { %v950_v17 = vrot.slane %v949_v62, 2  ;;  %v973_v56 = vrot.slane %v972_v46, 1 }
 0x159   : > { %v813_v59 = vpop.f32.mrf.mxu0  ;;  %v881_v41 = vadd.f32 %v880_v28, %v832_v12  ;;  %v976_v9 = vrot.slane %v975_v43, 4  ;;  %v966_v51 = vrot.slane %v965_v54, 1  ;;  %v1018_v16 = vsel %vm1017_vm7, %v946_v45, %v939_v52 }
 0x15a   : > { %v814_v14 = vadd.f32 %v2040_v3, %v813_v59 }
 0x15b   : > { %v899_v24 = vmax.f32 %v881_v41, 0.0  ;;  %v977_v13 = vmax.f32 %v975_v43, %v976_v9  ;;  %v967_v12 = vmax.f32 %v965_v54, %v966_v51  ;;  %v974_v43 = vmax.f32 %v972_v46, %v973_v56  ;;  %v1397_v41 = vld [vmem:[%s2179_s4] ss:$0 sm:$0xff] }
 0x15c   : > { %v863_v55 = vadd.f32 %v2020_v22, %v814_v14  ;;  %v923_v22 = vmul.f32 %v907_v6, %v891_v39 }
 0x15d   : > { %v931_v2 = vmul.f32 %v915_v63, %v899_v24  ;;  %v978_v38 = vrot.slane %v977_v13, 2 }
 0x15e   : > { %v892_v5 = vmax.f32 %v863_v55, 0.0  ;;  %v833_v57 = vpop.f32.mrf.mxu3 }
 0x15f   : > { %v834_v19 = vadd.f32 %v2040_v3, %v833_v57  ;;  %v951_v3 = vmax.f32 %v949_v62, %v950_v17  ;;  %v979_v49 = vmax.f32 %v977_v13, %v978_v38 }
 0x160   : > { %v924_v61 = vmul.f32 %v908_v58, %v892_v5 }
 0x161   : > { %v883_v26 = vadd.f32 %v882_v23, %v834_v19  ;;  %v952_v25 = vrot.slane %v951_v3, 1  ;;  %v980_v36 = vrot.slane %v979_v49, 1 }
 0x162   : > { %v954_v7 = vmax.f32 %v923_v22, %v924_v61 }
 0x163   : > { %v900_v33 = vmax.f32 %v883_v26, 0.0  ;;  %v953_v42 = vmax.f32 %v951_v3, %v952_v25  ;;  %v981_v0 = vmax.f32 %v979_v49, %v980_v36 }
 0x164   : > { %v955_v37 = vrot.slane %v954_v7, 4 }
 0x165   : > { %v932_v21 = vmul.f32 %v916_v32, %v900_v33  ;;  %v1020_v50 = vsel %vm1019_vm8, %v953_v42, %v1018_v16 }
 0x166   : > { %v956_v40 = vmax.f32 %v954_v7, %v955_v37 }
 0x167   : > { %v982_v44 = vmax.f32 %v931_v2, %v932_v21 }
 0x168   : > { %v957_v47 = vrot.slane %v956_v40, 2 }
 0x169   : > { %v983_v48 = vrot.slane %v982_v44, 4 }
 0x16a   : > { %v958_v30 = vmax.f32 %v956_v40, %v957_v47 }
 0x16b   : > { %v984_v28 = vmax.f32 %v982_v44, %v983_v48 }
 0x16c   : > { %v959_v4 = vrot.slane %v958_v30, 1 }
 0x16d   : > { %v985_v1 = vrot.slane %v984_v28, 2 }
 0x16e   : > { %v960_v8 = vmax.f32 %v958_v30, %v959_v4 }
 0x16f   : > { %v986_v59 = vmax.f32 %v984_v28, %v985_v1 }
 0x170   : > { %v1022_v14 = vsel %vm1021_vm9, %v960_v8, %v1020_v50 }
 0x171   : > { %v987_v60 = vrot.slane %v986_v59, 1  ;;  %v1024_v62 = vsel %vm1023_vm10, %v967_v12, %v1022_v14 }
 0x172   : > { %v1026_v53 = vsel %vm1025_vm11, %v974_v43, %v1024_v62 }
 0x173   : > { %v988_v39 = vmax.f32 %v986_v59, %v987_v60  ;;  %v1028_v55 = vsel %vm1027_vm12, %v981_v0, %v1026_v53 }
 0x175   : > { %v1030_v6 = vsel %vm1029_vm13, %v988_v39, %v1028_v55 }
 0x176   : > { %1048 = vmatmul.f32.vlgmr.msrb.gmra.mxu2 %v1030_v6 }
 0x1f9   : > { %v1049_v58 = vpop.f32.mrf.mxu2 }
 0x1fa   : > { %v1050_v10 = vadd.f32 %v1397_v41, %v1049_v58 }
 0x1fc   : > { %1052 = vst [vmem:[%s262_s29] sm:$0xff] %v1050_v10 }
 0x1fd   : > { %1455 = shalt.err (!%p1452_p8)
}
 0x1fe   : > { %1225 = dma.vmem_to_hbm [thread:$0]  (%p1575_p5), %s1067_s9, 128, %s1069_s10, %s1054_s11  }
 0x1ff PF: > { %p1237_p9 = scmp.ge.s32.totalorder %s1494_s24, 2  ;;  %s1080_s15 = sand.u32 1, %s1482_s21  }
 0x200   : > { %s1081_s19 = scalar_lea.sflag [#allocation4], %s1080_s15 }
 0x201   : > { %p1232_p10 = pnand %p1237_p9, %p1579_p6 }
 0x203   : > { %p1233_p11 = pneg %p1232_p10 }
 0x205   : > { %1477 = dma.done.wait (%p1233_p11), %s1081_s19, 128  }
 0x206   : > { %1479 = vsyncadd (%p1233_p11), %s1081_s19, 4294967168  ;;  %p17_p12 = scmp.ge.s32.totalorder %s1562_s27, 4   ;;  %s2184_s21 = smov %s1486_s22 }
 0x207   : > { %s2185_s22 = smov %s1490_s23  ;;  %s2186_s23 = smov %s1573_s30 }
 0x208   : > { %s2187_s24 = smov %s1562_s27  ;;  %19 = sbr.rel (!%p17_p12) target bundleno = 4 (0x4), region = 84 }
 0x20d   :  { %1087 = vsyncpa [#allocation3], 1 }
 0x20e   :  { %1089 = vsyncpa [#allocation3 + $0x1], 1 }
 0x20f   :  { %1090 = vsyncpa [#allocation4], 1 }
 0x210   :  { %1092 = vsyncpa [#allocation4 + $0x1], 1 }

</bundles_post_ra>
